<compile_context>
chip_gen: v7x
topology: tpu7x:2x2x1
jax: 0.10.0
libtpu: 0.0.40
codegen_flags: <defaults>
</compile_context>

<pallas_src>
import functools

import jax
import jax.numpy as jnp
from jax.experimental import pallas as pl
from jax.experimental.pallas import tpu as pltpu


LANE = 128                                   # pad logits to a lane-dense last dim
_VMEM_INPUT_BUDGET = 24 * 1024 * 1024        # 2 inputs x 2 buffers of (TB,TS,H) must fit here
_VMEM_LIMIT_BYTES = 48 * 1024 * 1024         # scoped VMEM limit (safe on v7x 64 MiB physical)


def _pick_tile(total, desired, align):
    """Largest multiple of `align` <= desired that divides `total`; else `total`."""
    if total <= desired:
        return total
    t = (desired // align) * align
    while t >= align:
        if total % t == 0:
            return t
        t -= align
    return total


def _choose_tiles(B, S, H, itemsize):
    """Batch/seq tile sizes keeping the double-buffered input streams in budget."""
    tb = B if B <= 8 else _pick_tile(B, 8, 8)
    # 2 input streams x 2 pipeline buffers of (tb, ts, H) elements
    max_ts = max(8, _VMEM_INPUT_BUDGET // (4 * tb * H * itemsize))
    ts = S if S <= max_ts else _pick_tile(S, max_ts, 8)
    return tb, ts


def baseline_kernel(vh_ref, vl_ref, w1vh_ref, w1vl_ref, b1_ref, w2t_ref, b2_ref,
                    out_ref, acc_vh, acc_vl, *, inv_seq_len):
    """Grid = (batch_tile, seq_tile).  Seq is the reduction axis.

    vh_ref, vl_ref : (TB, TS, H)   hidden-state tiles of the two chains
    w1vh_ref       : (H, E)        first H rows of projection weight^T (VH half)
    w1vl_ref       : (H, E)        last  H rows of projection weight^T (VL half)
    b1_ref         : (1, E)
    w2t_ref        : (E, Cpad)     head weight^T, zero-padded to 128 lanes
    b2_ref         : (1, Cpad)
    out_ref        : (TB, Cpad)    lane-dense logits
    acc_vh, acc_vl : (TB, H) f32   pooled-sum accumulators (VMEM scratch)
    """
    si = pl.program_id(1)

    @pl.when(si == 0)
    def _():
        acc_vh[...] = jnp.zeros_like(acc_vh)
        acc_vl[...] = jnp.zeros_like(acc_vl)

    # Partial sums over this seq tile (accumulate in f32 regardless of input dtype).
    acc_vh[...] += jnp.sum(vh_ref[...].astype(jnp.float32), axis=1)
    acc_vl[...] += jnp.sum(vl_ref[...].astype(jnp.float32), axis=1)

    @pl.when(si == pl.num_programs(1) - 1)
    def _():
        # torch.mean(last_hidden_state, 1): scale the pooled sums once.
        mvh = acc_vh[...] * inv_seq_len
        mvl = acc_vl[...] * inv_seq_len

        # projection: concat(mvh, mvl) @ W1^T + b1  ==  mvh @ W1t[:H] + mvl @ W1t[H:] + b1
        h = (jnp.dot(mvh, w1vh_ref[...], preferred_element_type=jnp.float32)
             + jnp.dot(mvl, w1vl_ref[...], preferred_element_type=jnp.float32)
             + b1_ref[...])
        # LeakyReLU (negative_slope = 0.01)
        h = jnp.where(h > 0, h, 0.01 * h)

        # head: Linear(E, nn_classes) on lane-padded weights
        y = jnp.dot(h, w2t_ref[...], preferred_element_type=jnp.float32) + b2_ref[...]
        out_ref[...] = y.astype(out_ref.dtype)


def prepare_params(w1, b1, w2, b2):
    """One-time parameter prep (transpose + lane padding), done outside the hot path.

    w1 : (E, 2E)  PyTorch Linear layout [out_features, in_features]
    b1 : (E,)
    w2 : (C, E)
    b2 : (C,)
    """
    w1 = jnp.asarray(w1, jnp.float32)
    b1 = jnp.asarray(b1, jnp.float32)
    w2 = jnp.asarray(w2, jnp.float32)
    b2 = jnp.asarray(b2, jnp.float32)

    E, two_h = w1.shape
    H = two_h // 2
    C = w2.shape[0]
    c_pad = max(LANE, ((C + LANE - 1) // LANE) * LANE)

    w1t = w1.T                                      # (2H, E)
    w1t_vh = w1t[:H]                                # (H, E)
    w1t_vl = w1t[H:]                                # (H, E)
    b1_2d = b1.reshape(1, E)

    w2t_pad = jnp.zeros((E, c_pad), jnp.float32).at[:, :C].set(w2.T)
    b2_pad = jnp.zeros((1, c_pad), jnp.float32).at[:, :C].set(b2.reshape(1, C))

    return dict(w1t_vh=w1t_vh, w1t_vl=w1t_vl, b1=b1_2d,
                w2t=w2t_pad, b2=b2_pad, n_classes=C)


def baseline_forward(vh_hidden, vl_hidden, params, *, tb=None, ts=None):
    """vh_hidden, vl_hidden : (B, S, H) hidden states of the two chains."""
    B, S, H = vh_hidden.shape
    E = params["w1t_vh"].shape[1]
    c_pad = params["w2t"].shape[1]
    C = params["n_classes"]

    itemsize = jnp.dtype(vh_hidden.dtype).itemsize
    auto_tb, auto_ts = _choose_tiles(B, S, H, itemsize)
    tb = auto_tb if tb is None else tb
    ts = auto_ts if ts is None else ts
    assert B % tb == 0 and S % ts == 0, (B, S, tb, ts)

    grid = (B // tb, S // ts)
    kernel = functools.partial(baseline_kernel, inv_seq_len=1.0 / S)

    in_specs = [
        pl.BlockSpec((tb, ts, H), lambda bi, si: (bi, si, 0)),     # VH tiles
        pl.BlockSpec((tb, ts, H), lambda bi, si: (bi, si, 0)),     # VL tiles
        pl.BlockSpec((H, E), lambda bi, si: (0, 0)),               # W1^T (VH half)
        pl.BlockSpec((H, E), lambda bi, si: (0, 0)),               # W1^T (VL half)
        pl.BlockSpec((1, E), lambda bi, si: (0, 0)),               # b1
        pl.BlockSpec((E, c_pad), lambda bi, si: (0, 0)),           # W2^T (lane-padded)
        pl.BlockSpec((1, c_pad), lambda bi, si: (0, 0)),           # b2 (lane-padded)
    ]
    out_spec = pl.BlockSpec((tb, c_pad), lambda bi, si: (bi, 0))

    weight_bytes = (2 * H * E + E + E * c_pad + c_pad) * 4
    cost = pl.CostEstimate(
        flops=(2 * B * S * H                 # pooling adds (both chains)
               + 2 * B * (2 * H) * E         # projection matmul
               + 2 * B * E * c_pad),         # head matmul
        transcendentals=0,
        bytes_accessed=2 * B * S * H * itemsize + weight_bytes + B * c_pad * 4,
    )

    logits_pad = pl.pallas_call(
        kernel,
        out_shape=jax.ShapeDtypeStruct((B, c_pad), jnp.float32),
        grid_spec=pltpu.PrefetchScalarGridSpec(
            num_scalar_prefetch=0,
            grid=grid,
            in_specs=in_specs,
            out_specs=out_spec,
            scratch_shapes=[pltpu.VMEM((tb, H), jnp.float32),
                            pltpu.VMEM((tb, H), jnp.float32)],
        ),
        compiler_params=pltpu.CompilerParams(
            dimension_semantics=("parallel", "arbitrary"),
            vmem_limit_bytes=_VMEM_LIMIT_BYTES,
        ),
        cost_estimate=cost,
    )(vh_hidden, vl_hidden,
      params["w1t_vh"], params["w1t_vl"], params["b1"],
      params["w2t"], params["b2"])

    # Strip the lane padding to the true nn_classes width.
    return logits_pad[:, :C]


def reference_forward(vh_hidden, vl_hidden, w1, b1, w2, b2):
    mvh = jnp.mean(vh_hidden, axis=1)
    mvl = jnp.mean(vl_hidden, axis=1)
    x = jnp.concatenate([mvh, mvl], axis=1)
    h = x @ w1.T + b1
    h = jnp.where(h > 0, h, 0.01 * h)
    return h @ w2.T + b2


if __name__ == "__main__":
    # Small, module-consistent shapes, chosen so the grid has 2 batch tiles
    # ("parallel") x 2 seq tiles (reduction): batch=16, seq=16, hidden=32, classes=2.
    B, S, H = 16, 16, 32
    E = H               # embedding_length (stands in for MAX_LEN * 2 = 1024 in protbert)
    C = 2               # nn_classes

    key = jax.random.PRNGKey(0)
    k_vh, k_vl, k_w1, k_b1, k_w2, k_b2 = jax.random.split(key, 6)

    # "encoder outputs": last_hidden_state for VH and VL chains
    vh_hidden = jax.random.normal(k_vh, (B, S, H), dtype=jnp.float32)
    vl_hidden = jax.random.normal(k_vl, (B, S, H), dtype=jnp.float32)

    # Deterministic parameter init (PyTorch Linear layout: [out, in])
    w1 = jax.random.normal(k_w1, (E, 2 * E), dtype=jnp.float32) * 0.05
    b1 = jax.random.normal(k_b1, (E,), dtype=jnp.float32) * 0.05
    w2 = jax.random.normal(k_w2, (C, E), dtype=jnp.float32) * 0.05
    b2 = jax.random.normal(k_b2, (C,), dtype=jnp.float32) * 0.05

    # One-time parameter prep (transpose / pad) — outside the hot forward path.
    params = prepare_params(w1, b1, w2, b2)

    # Explicit small tiles so the test exercises both grid axes (2 x 2).
    out = baseline_forward(vh_hidden, vl_hidden, params, tb=8, ts=8)
    out = jax.block_until_ready(out)

    ref = reference_forward(vh_hidden, vl_hidden, w1, b1, w2, b2)
    assert out.shape == (B, C), out.shape
    assert jnp.allclose(out, ref, atol=1e-4, rtol=1e-4), (out, ref)

    print("KERNEL_OK")
</pallas_src>

<mosaic_0001>
module attributes {stable_mosaic.version = 11 : i64} {
  func.func @baseline_kernel(%arg0: i32, %arg1: i32, %arg2: memref<8x8x32xf32, #tpu.memory_space<vmem>>, %arg3: memref<8x8x32xf32, #tpu.memory_space<vmem>>, %arg4: memref<32x32xf32, #tpu.memory_space<vmem>>, %arg5: memref<32x32xf32, #tpu.memory_space<vmem>>, %arg6: memref<1x32xf32, #tpu.memory_space<vmem>>, %arg7: memref<32x128xf32, #tpu.memory_space<vmem>>, %arg8: memref<1x128xf32, #tpu.memory_space<vmem>>, %arg9: memref<8x128xf32, #tpu.memory_space<vmem>>, %arg10: memref<8x32xf32, #tpu.memory_space<vmem>>, %arg11: memref<8x32xf32, #tpu.memory_space<vmem>>) attributes {dimension_semantics = [#tpu.dimension_semantics<parallel>, #tpu.dimension_semantics<arbitrary>], iteration_bounds = array<i64: 2, 2>, scalar_prefetch = 0 : i64, scratch_operands = 2 : i64, tpu.core_type = #tpu.core_type<tc>, window_params = [{transform_indices = @transform_0, window_bounds = array<i64: 8, 8, 32>}, {transform_indices = @transform_1, window_bounds = array<i64: 8, 8, 32>}, {pipeline_mode = #tpu.pipeline_mode<synchronous>, transform_indices = @transform_2, window_bounds = array<i64: 32, 32>}, {pipeline_mode = #tpu.pipeline_mode<synchronous>, transform_indices = @transform_3, window_bounds = array<i64: 32, 32>}, {pipeline_mode = #tpu.pipeline_mode<synchronous>, transform_indices = @transform_4, window_bounds = array<i64: 1, 32>}, {pipeline_mode = #tpu.pipeline_mode<synchronous>, transform_indices = @transform_5, window_bounds = array<i64: 32, 128>}, {pipeline_mode = #tpu.pipeline_mode<synchronous>, transform_indices = @transform_6, window_bounds = array<i64: 1, 128>}, {transform_indices = @transform_7, window_bounds = array<i64: 8, 128>}]} {
    %c0_i32 = arith.constant 0 : i32
    %0 = arith.cmpi eq, %arg1, %c0_i32 : i32
    %1 = arith.extui %0 : i1 to i32
    %c0_i32_0 = arith.constant 0 : i32
    %2 = arith.cmpi ne, %1, %c0_i32_0 : i32
    scf.if %2 {
      %cst_16 = arith.constant 0.000000e+00 : f32
      %16 = vector.broadcast %cst_16 : f32 to vector<8x32xf32>
      %c0_17 = arith.constant 0 : index
      %c0_18 = arith.constant 0 : index
      %17 = vector.load %arg10[%c0_17, %c0_18] : memref<8x32xf32, #tpu.memory_space<vmem>>, vector<8x32xf32>
      tpu.vector_store %arg10[%c0_17, %c0_18], %16 {strides = array<i32>} : memref<8x32xf32, #tpu.memory_space<vmem>>, vector<8x32xf32>,
      %cst_19 = arith.constant 0.000000e+00 : f32
      %18 = vector.broadcast %cst_19 : f32 to vector<8x32xf32>
      %c0_20 = arith.constant 0 : index
      %c0_21 = arith.constant 0 : index
      %19 = vector.load %arg11[%c0_20, %c0_21] : memref<8x32xf32, #tpu.memory_space<vmem>>, vector<8x32xf32>
      tpu.vector_store %arg11[%c0_20, %c0_21], %18 {strides = array<i32>} : memref<8x32xf32, #tpu.memory_space<vmem>>, vector<8x32xf32>,
    } else {
    }
    %c0 = arith.constant 0 : index
    %c0_1 = arith.constant 0 : index
    %3 = vector.load %arg10[%c0, %c0_1] : memref<8x32xf32, #tpu.memory_space<vmem>>, vector<8x32xf32>
    %c0_2 = arith.constant 0 : index
    %c0_3 = arith.constant 0 : index
    %c0_4 = arith.constant 0 : index
    %4 = vector.load %arg2[%c0_2, %c0_3, %c0_4] : memref<8x8x32xf32, #tpu.memory_space<vmem>>, vector<8x8x32xf32>
    %cst = arith.constant dense<0.000000e+00> : vector<8x32xf32>
    %5 = vector.multi_reduction <add>, %4, %cst [1] : vector<8x8x32xf32> to vector<8x32xf32>
    %6 = arith.addf %3, %5 : vector<8x32xf32>
    %c0_5 = arith.constant 0 : index
    %c0_6 = arith.constant 0 : index
    %7 = vector.load %arg10[%c0_5, %c0_6] : memref<8x32xf32, #tpu.memory_space<vmem>>, vector<8x32xf32>
    tpu.vector_store %arg10[%c0_5, %c0_6], %6 {strides = array<i32>} : memref<8x32xf32, #tpu.memory_space<vmem>>, vector<8x32xf32>,
    %c0_7 = arith.constant 0 : index
    %c0_8 = arith.constant 0 : index
    %8 = vector.load %arg11[%c0_7, %c0_8] : memref<8x32xf32, #tpu.memory_space<vmem>>, vector<8x32xf32>
    %c0_9 = arith.constant 0 : index
    %c0_10 = arith.constant 0 : index
    %c0_11 = arith.constant 0 : index
    %9 = vector.load %arg3[%c0_9, %c0_10, %c0_11] : memref<8x8x32xf32, #tpu.memory_space<vmem>>, vector<8x8x32xf32>
    %cst_12 = arith.constant dense<0.000000e+00> : vector<8x32xf32>
    %10 = vector.multi_reduction <add>, %9, %cst_12 [1] : vector<8x8x32xf32> to vector<8x32xf32>
    %11 = arith.addf %8, %10 : vector<8x32xf32>
    %c0_13 = arith.constant 0 : index
    %c0_14 = arith.constant 0 : index
    %12 = vector.load %arg11[%c0_13, %c0_14] : memref<8x32xf32, #tpu.memory_space<vmem>>, vector<8x32xf32>
    tpu.vector_store %arg11[%c0_13, %c0_14], %11 {strides = array<i32>} : memref<8x32xf32, #tpu.memory_space<vmem>>, vector<8x32xf32>,
    %c1_i32 = arith.constant 1 : i32
    %13 = arith.cmpi eq, %arg1, %c1_i32 : i32
    %14 = arith.extui %13 : i1 to i32
    %c0_i32_15 = arith.constant 0 : i32
    %15 = arith.cmpi ne, %14, %c0_i32_15 : i32
    scf.if %15 {
      %c0_16 = arith.constant 0 : index
      %c0_17 = arith.constant 0 : index
      %16 = vector.load %arg10[%c0_16, %c0_17] : memref<8x32xf32, #tpu.memory_space<vmem>>, vector<8x32xf32>
      %cst_18 = arith.constant 6.250000e-02 : f32
      %17 = vector.broadcast %cst_18 : f32 to vector<8x32xf32>
      %18 = arith.mulf %16, %17 : vector<8x32xf32>
      %c0_19 = arith.constant 0 : index
      %c0_20 = arith.constant 0 : index
      %19 = vector.load %arg11[%c0_19, %c0_20] : memref<8x32xf32, #tpu.memory_space<vmem>>, vector<8x32xf32>
      %cst_21 = arith.constant 6.250000e-02 : f32
      %20 = vector.broadcast %cst_21 : f32 to vector<8x32xf32>
      %21 = arith.mulf %19, %20 : vector<8x32xf32>
      %c0_22 = arith.constant 0 : index
      %c0_23 = arith.constant 0 : index
      %22 = vector.load %arg4[%c0_22, %c0_23] : memref<32x32xf32, #tpu.memory_space<vmem>>, vector<32x32xf32>
      %cst_24 = arith.constant dense<0.000000e+00> : vector<8x32xf32>
      %23 = tpu.matmul %18, %22, %cst_24 {dimension_numbers = #tpu.dot_dimension_numbers<[1], [0], [0], [1], [0, 0, 1, 1], [], []>} : vector<8x32xf32>, vector<32x32xf32>, vector<8x32xf32> -> vector<8x32xf32>
      %c0_25 = arith.constant 0 : index
      %c0_26 = arith.constant 0 : index
      %24 = vector.load %arg5[%c0_25, %c0_26] : memref<32x32xf32, #tpu.memory_space<vmem>>, vector<32x32xf32>
      %cst_27 = arith.constant dense<0.000000e+00> : vector<8x32xf32>
      %25 = tpu.matmul %21, %24, %cst_27 {dimension_numbers = #tpu.dot_dimension_numbers<[1], [0], [0], [1], [0, 0, 1, 1], [], []>} : vector<8x32xf32>, vector<32x32xf32>, vector<8x32xf32> -> vector<8x32xf32>
      %26 = arith.addf %23, %25 : vector<8x32xf32>
      %c0_28 = arith.constant 0 : index
      %c0_29 = arith.constant 0 : index
      %27 = vector.load %arg6[%c0_28, %c0_29] : memref<1x32xf32, #tpu.memory_space<vmem>>, vector<1x32xf32>
      %28 = vector.broadcast %27 : vector<1x32xf32> to vector<8x32xf32>
      %29 = arith.addf %26, %28 : vector<8x32xf32>
      %cst_30 = arith.constant 0.000000e+00 : f32
      %30 = vector.broadcast %cst_30 : f32 to vector<8x32xf32>
      %31 = arith.cmpf ogt, %29, %30 : vector<8x32xf32>
      %cst_31 = arith.constant 0.00999999977 : f32
      %32 = vector.broadcast %cst_31 : f32 to vector<8x32xf32>
      %33 = arith.mulf %32, %29 : vector<8x32xf32>
      %34 = arith.select %31, %29, %33 : vector<8x32xi1>, vector<8x32xf32>
      %c0_32 = arith.constant 0 : index
      %c0_33 = arith.constant 0 : index
      %35 = vector.load %arg7[%c0_32, %c0_33] : memref<32x128xf32, #tpu.memory_space<vmem>>, vector<32x128xf32>
      %cst_34 = arith.constant dense<0.000000e+00> : vector<8x128xf32>
      %36 = tpu.matmul %34, %35, %cst_34 {dimension_numbers = #tpu.dot_dimension_numbers<[1], [0], [0], [1], [0, 0, 1, 1], [], []>} : vector<8x32xf32>, vector<32x128xf32>, vector<8x128xf32> -> vector<8x128xf32>
      %c0_35 = arith.constant 0 : index
      %c0_36 = arith.constant 0 : index
      %37 = vector.load %arg8[%c0_35, %c0_36] : memref<1x128xf32, #tpu.memory_space<vmem>>, vector<1x128xf32>
      %38 = vector.broadcast %37 : vector<1x128xf32> to vector<8x128xf32>
      %39 = arith.addf %36, %38 : vector<8x128xf32>
      %c0_37 = arith.constant 0 : index
      %c0_38 = arith.constant 0 : index
      %40 = vector.load %arg9[%c0_37, %c0_38] : memref<8x128xf32, #tpu.memory_space<vmem>>, vector<8x128xf32>
      tpu.vector_store %arg9[%c0_37, %c0_38], %39 {strides = array<i32>} : memref<8x128xf32, #tpu.memory_space<vmem>>, vector<8x128xf32>,
    } else {
    }
    return
  }
  func.func @transform_0(%arg0: i32, %arg1: i32) -> (i32, i32, i32) {
    %c0_i32 = arith.constant 0 : i32
    %c0_i32_0 = arith.constant 0 : i32
    return %arg0, %arg1, %c0_i32 : i32, i32, i32
  }
  func.func @transform_1(%arg0: i32, %arg1: i32) -> (i32, i32, i32) {
    %c0_i32 = arith.constant 0 : i32
    %c0_i32_0 = arith.constant 0 : i32
    return %arg0, %arg1, %c0_i32 : i32, i32, i32
  }
  func.func @transform_2(%arg0: i32, %arg1: i32) -> (i32, i32) {
    %c0_i32 = arith.constant 0 : i32
    %c0_i32_0 = arith.constant 0 : i32
    %c0_i32_1 = arith.constant 0 : i32
    return %c0_i32, %c0_i32_0 : i32, i32
  }
  func.func @transform_3(%arg0: i32, %arg1: i32) -> (i32, i32) {
    %c0_i32 = arith.constant 0 : i32
    %c0_i32_0 = arith.constant 0 : i32
    %c0_i32_1 = arith.constant 0 : i32
    return %c0_i32, %c0_i32_0 : i32, i32
  }
  func.func @transform_4(%arg0: i32, %arg1: i32) -> (i32, i32) {
    %c0_i32 = arith.constant 0 : i32
    %c0_i32_0 = arith.constant 0 : i32
    %c0_i32_1 = arith.constant 0 : i32
    return %c0_i32, %c0_i32_0 : i32, i32
  }
  func.func @transform_5(%arg0: i32, %arg1: i32) -> (i32, i32) {
    %c0_i32 = arith.constant 0 : i32
    %c0_i32_0 = arith.constant 0 : i32
    %c0_i32_1 = arith.constant 0 : i32
    return %c0_i32, %c0_i32_0 : i32, i32
  }
  func.func @transform_6(%arg0: i32, %arg1: i32) -> (i32, i32) {
    %c0_i32 = arith.constant 0 : i32
    %c0_i32_0 = arith.constant 0 : i32
    %c0_i32_1 = arith.constant 0 : i32
    return %c0_i32, %c0_i32_0 : i32, i32
  }
  func.func @transform_7(%arg0: i32, %arg1: i32) -> (i32, i32) {
    %c0_i32 = arith.constant 0 : i32
    %c0_i32_0 = arith.constant 0 : i32
    return %arg0, %c0_i32 : i32, i32
  }
}

</mosaic_0001>

<bundles_post_ra>
// kernel: tpu_custom_call.1
= control target key start
LH: loop header
LB: loop body
LE: loop exit
PB: predicated region body
PF: predicated region fallthrough
CT: control target
= control target key end

     0   :  { %s2029_s0 = inlined_call_operand.hbm [shape: f32[16,16,32], index: 0, kind: input, shape index: {}]   ;;  %s2030_s1 = inlined_call_operand.hbm [shape: f32[16,16,32], index: 1, kind: input, shape index: {}]   ;;  %s2031_s2 = inlined_call_operand.hbm [shape: f32[32,32], index: 2, kind: input, shape index: {}]   ;;  %s2032_s3 = inlined_call_operand.hbm [shape: f32[32,32], index: 3, kind: input, shape index: {}]   ;;  %s2033_s4 = inlined_call_operand.vmem [shape: f32[1,32], index: 4, kind: input, shape index: {}]   ;;  %s2034_s5 = inlined_call_operand.hbm [shape: f32[32,128], index: 5, kind: input, shape index: {}]   ;;  %s2035_s6 = inlined_call_operand.vmem [shape: f32[1,128], index: 6, kind: input, shape index: {}]   ;;  %s2036_s7 = inlined_call_operand.hbm [shape: f32[16,128], index: 7, kind: output, shape index: {}]  }
   0x1   :  { %2053 = sst [smem:[#allocation26_spill]] %s2029_s0 }
   0x2   :  { %2054 = sst [smem:[#allocation27_spill]] %s2031_s2 }
   0x3   :  { %2055 = sst [smem:[#allocation28_spill]] %s2032_s3 }
   0x4   :  { %2056 = sst [smem:[#allocation29_spill]] %s2033_s4 }
   0x5   :  { %2057 = sst [smem:[#allocation30_spill]] %s2034_s5 }
   0x6   :  { %2058 = sst [smem:[#allocation31_spill]] %s2035_s6 }
   0x7   :  { %2059 = sst [smem:[#allocation32_spill]] %s2036_s7 }
   0x8   :  { %12 = vsyncpa [#allocation5], 0 }
   0x9   :  { %14 = vsyncpa [#allocation5 + $0x1], 0 }
   0xa   :  { %15 = vsyncpa [#allocation8], 0 }
   0xb   :  { %17 = vsyncpa [#allocation8 + $0x1], 0 }
   0xc   :  { %18 = vsyncpa [#allocation11], 0 }
   0xd   :  { %19 = vsyncpa [#allocation6], 0 }
   0xe   :  { %21 = vsyncpa [#allocation6 + $0x1], 0  ;;  %s1570_s24 = smov 0   ;;  %s1572_s25 = smov 0  }
   0xf   :  { %s1574_s26 = smov 0   ;;  %s1576_s27 = smov 0  }
  0x10   :  { %s1578_s28 = smov 0   ;;  %s1580_s29 = smov 0  }
  0x11   :  { %s1582_s30 = smov 0   ;;  %s1584_s8 = smov 0  }
  0x12   :  { %s1586_s9 = smov 0   ;;  %s1588_s10 = smov 0  }
  0x13   :  { %s1590_s11 = smov 0  }
  0x14 LB: > { %2060 = sst [smem:[#allocation19_spill]] %s1475_s24  ;;  %s1624_s12 = sadd.s32 4294967295, %s1515_s11   ;;  %s1515_s11 = sphi %s1590_s11, %s27_s11   ;;  %s1511_s10 = sphi %s1588_s10, %s2113_s10   ;;  %s1507_s9 = sphi %s1586_s9, %s2112_s9   ;;  %s1503_s8 = sphi %s1584_s8, %s2111_s8   ;;  %s1499_s30 = sphi %s1582_s30, %s2110_s30   ;;  %s1495_s29 = sphi %s1580_s29, %s2109_s29   ;;  %s1491_s28 = sphi %s1578_s28, %s2108_s28   ;;  %s1487_s27 = sphi %s1576_s27, %s2107_s27   ;;  %s1483_s26 = sphi %s1574_s26, %s2106_s26   ;;  %s1479_s25 = sphi %s1572_s25, %s2105_s25   ;;  %s1475_s24 = sphi %s1570_s24, %s2104_s24  }
  0x15   : > { %2061 = sst [smem:[#allocation20_spill]] %s1499_s30  ;;  %s992_s13 = sadd.s32 4294967294, %s1515_s11  }
  0x16   : > { %2062 = sst [smem:[#allocation21_spill]] %s1503_s8  ;;  %p55_p0 = scmp.ne.s32.totalorder %s1495_s29, %s1491_s28 }
  0x17   : > { %p56_p1 = scmp.eq.s32.totalorder %s1515_s11, 0  ;;  %p61_p2 = scmp.ne.s32.totalorder %s1491_s28, %s1487_s27 }
  0x18   : > { %p2042_p3 = scmp.eq.s32.totalorder %s1624_s12, 0  ;;  %p217_p5 = scmp.ne.s32.totalorder %s1483_s26, %s1479_s25 }
  0x19   : > { %p1634_p4 = por %p56_p1, %p55_p0  ;;  %p218_p7 = scmp.eq.s32.totalorder %s1624_s12, 3 }
  0x1a   : > { %p1642_p6 = por %p2042_p3, %p61_p2  ;;  %p223_p8 = scmp.ne.s32.totalorder %s1479_s25, %s1475_s24 }
  0x1b   : > { %p224_p9 = scmp.eq.s32.totalorder %s992_s13, 3  ;;  %p1649_p10 = por %p218_p7, %p217_p5 }
  0x1c   : > { %s2064_s17 = scalar_select %p1642_p6, 1, 0 }
  0x1d   : > { %s2065_s18 = scalar_select %p1649_p10, 1, 0 }
  0x1e   : > { %p993_p11 = scmp.ge.s32.totalorder %s1515_s11, 1  ;;  %p1654_p12 = por %p224_p9, %p223_p8 }
  0x1f   : > { %2066 = sst [smem:[#allocation22_spill]] %s2065_s18  ;;  %p231_p13 = scmp.lt.s32.totalorder %s1515_s11, 5 }
  0x20   : > { %s2067_s19 = scalar_select %p1654_p12, 1, 0 }
  0x21   : > { %p1659_p0 = pnand %p993_p11, %p231_p13  ;;  %s1517_s21 = smov [#allocation9]  }
  0x22   : > { %2068 = sst [smem:[#allocation23_spill]] %s2067_s19  ;;  %s243_s22 = sshll.u32 %s1517_s21, 4  ;;  %s1663_s22 = int_to_ptr.vmem [resolvable:$true] %s243_s22 }
  0x23   : > { %s2069_s20 = scalar_select %p1659_p0, 1, 0 }
  0x24   : > { %p1110_p1 = pneg %p1659_p0  ;;  %p1134_p2 = scmp.lt.s32.totalorder %s1515_s11, 4 }
  0x25   : > { %s1518_s13 = smov [#allocation10]   ;;  %s2072_s2 = sld [smem:[#allocation27_spill]] }
  0x26   : > { %p1670_p5 = pnand %p1110_p1, %p2042_p3  ;;  %p1676_p7 = pnand %p1134_p2, %p1634_p4 }
  0x27   : > { %s256_s14 = sshll.u32 %s1518_s13, 4  ;;  %s1680_s14 = int_to_ptr.vmem [resolvable:$true] %s256_s14 }
  0x28   : > { %s2071_s27 = scalar_select %p1676_p7, 1, 0 }
  0x29   : > { %p1690_p9 = pneg %p1670_p5 }
  0x2b   : > { %s1237_s19 = scalar_lea.hbm %s2072_s2, 512 }
  0x2c   : > { %p1238_p8 = scmp.ne.s32.totalorder %s2072_s2, %s1237_s19  ;;  %p1244_p13 = scmp.lt.u32.totalorder %s1237_s19, %s2072_s2 }
  0x2e   : > { %p1240_p4 = pnand %p1690_p9, %p1238_p8 }
  0x30   : > { %p1241_p11 = pneg %p1240_p4 }
  0x32   : > { %p1246_p1 = pnand %p1244_p13, %p1241_p11 }
  0x34   : > { %1249 = shalt.err (!%p1246_p1)
}
  0x35   : > { %s1250_s7 = scalar_lea.vmem %s1663_s22, 512  ;;  %p1258_p10 = scmp.lt.s32.totalorder %s1663_s22, %s1663_s22 }
  0x36   : > { %p1251_p2 = scmp.ne.s32.totalorder %s1663_s22, %s1250_s7  ;;  %p1259_p6 = scmp.lt.s32.totalorder %s1250_s7, %s1250_s7 }
  0x38   : > { %p1253_p3 = pnand %p1251_p2, %p1690_p9  ;;  %p1260_p8 = por %p1259_p6, %p1258_p10 }
  0x3a   : > { %p1254_p12 = pneg %p1253_p3 }
  0x3c   : > { %p1261_p4 = pnand %p1260_p8, %p1254_p12 }
  0x3e   : > { %1264 = shalt.err (!%p1261_p4)
}
  0x3f   : > { %s2047_s24 = smov 128   ;;  %s2049_s15 = smov 8  }
  0x40   : > { %1113 = dma.hbm_to_vmem [thread:$0]  (!%p1670_p5), %s2072_s2, 512, %s1663_s22, [#allocation8], %s2047_s24, %s2047_s24, %s2049_s15  }
  0x41   : > { %s2074_s3 = sld [smem:[#allocation28_spill]] }
  0x47   : > { %s1265_s7 = scalar_lea.hbm %s2074_s3, 512 }
  0x48   : > { %p1266_p3 = scmp.ne.s32.totalorder %s2074_s3, %s1265_s7  ;;  %p1272_p12 = scmp.lt.u32.totalorder %s1265_s7, %s2074_s3 }
  0x4a   : > { %p1268_p6 = pnand %p1266_p3, %p1690_p9 }
  0x4c   : > { %p1269_p10 = pneg %p1268_p6 }
  0x4e   : > { %p1274_p11 = pnand %p1272_p12, %p1269_p10 }
  0x50   : > { %1277 = shalt.err (!%p1274_p11)
}
  0x51   : > { %s1278_s22 = scalar_lea.vmem %s1680_s14, 512  ;;  %p1286_p8 = scmp.lt.s32.totalorder %s1680_s14, %s1680_s14 }
  0x52   : > { %p1279_p13 = scmp.ne.s32.totalorder %s1680_s14, %s1278_s22  ;;  %p1287_p4 = scmp.lt.s32.totalorder %s1278_s22, %s1278_s22 }
  0x54   : > { %p1281_p1 = pnand %p1279_p13, %p1690_p9  ;;  %p1288_p3 = por %p1287_p4, %p1286_p8 }
  0x56   : > { %p1282_p2 = pneg %p1281_p1 }
  0x58   : > { %p1289_p6 = pnand %p1288_p3, %p1282_p2 }
  0x5a   : > { %1292 = shalt.err (!%p1289_p6)
}
  0x5b   : > { %1116 = dma.hbm_to_vmem [thread:$0]  (!%p1670_p5), %s2074_s3, 512, %s1680_s14, [#allocation11], %s2047_s24, %s2047_s24, %s2049_s15  }
  0x5c   : > { %s1521_s30 = smov [#allocation12]   ;;  %s2075_s5 = sld [smem:[#allocation30_spill]] }
  0x5d   : > { %s272_s8 = sshll.u32 %s1521_s30, 4  ;;  %s273_s8 = int_to_ptr.vmem [resolvable:$true] %s272_s8 }
  0x62   : > { %s1293_s21 = scalar_lea.hbm %s2075_s5, 512 }
  0x63   : > { %p1294_p10 = scmp.ne.s32.totalorder %s2075_s5, %s1293_s21  ;;  %p1300_p13 = scmp.lt.u32.totalorder %s1293_s21, %s2075_s5 }
  0x65   : > { %p1296_p12 = pnand %p1294_p10, %p1690_p9 }
  0x67   : > { %p1297_p11 = pneg %p1296_p12 }
  0x69   : > { %p1302_p1 = pnand %p1300_p13, %p1297_p11 }
  0x6b   : > { %1305 = shalt.err (!%p1302_p1)
}
  0x6c   : > { %s1306_s14 = scalar_lea.vmem %s273_s8, 512  ;;  %p1314_p3 = scmp.lt.s32.totalorder %s273_s8, %s273_s8 }
  0x6d   : > { %p1307_p2 = scmp.ne.s32.totalorder %s273_s8, %s1306_s14  ;;  %p1315_p6 = scmp.lt.s32.totalorder %s1306_s14, %s1306_s14 }
  0x6f   : > { %p1309_p8 = pnand %p1307_p2, %p1690_p9  ;;  %p1316_p0 = por %p1315_p6, %p1314_p3 }
  0x71   : > { %p1310_p4 = pneg %p1309_p8 }
  0x73   : > { %p1317_p7 = pnand %p1316_p0, %p1310_p4 }
  0x75   : > { %1320 = shalt.err (!%p1317_p7)
}
  0x76   : > { %1119 = dma.hbm_to_vmem [thread:$0]  (!%p1670_p5), %s2075_s5, 512, %s273_s8, [#allocation11], %s2047_s24, %s2047_s24, %s2049_s15  }
  0x77   : > { %s36_s16 = sadd.s32 1, %s1507_s9  ;;  %s39_s6 = sadd.s32 1, %s1511_s10 }
  0x78   : > { %p37_p0 = scmp.ge.s32.totalorder %s36_s16, 2  ;;  %s289_s30 = sand.u32 1, %s1495_s29  }
  0x79   : > { %s1764_s23 = sshll.u32 %s289_s30, 6  ;;  %s1024_s19 = sshll.u32 %s1511_s10, 4 }
  0x7a   : > { %s2115_s16 = smov (%p37_p0, %s36_s16), 0  ;;  %s2117_s6 = smov (!%p37_p0, %s39_s6), %s1511_s10 }
  0x7b   : > { %2076 = sst [smem:[#allocation24_spill]] %s2115_s16  ;;  %s44_s18 = ssub.s32 %s1507_s9, %s2115_s16 }
  0x7c   : > { %p41_p7 = scmp.ge.s32.totalorder %s2117_s6, 2  ;;  %s1773_s8 = sadd.s32 %s1507_s9, %s1024_s19 }
  0x7d   : > { %s293_s21 = scalar_lea.vmem [#allocation4], %s1764_s23  ;;  %s1001_s7 = sshll.u32 %s1773_s8, 7 }
  0x7e   : > { %s302_s13 = sshll.u32 %s293_s21, 4  ;;  %s2119_s6 = smov (%p41_p7, %s2117_s6), 0  ;;  %s1779_s13 = int_to_ptr.vmem [resolvable:$true] %s302_s13 }
  0x7f   : > { %2077 = sst [smem:[#allocation25_spill]] %s2119_s6  ;;  %s43_s22 = ssub.s32 %s1511_s10, %s2119_s6 }
  0x80   : > { %s2078_s0 = sld [smem:[#allocation26_spill]]  ;;  %s45_s19 = sor.u32 %s44_s18, %s43_s22 }
  0x81   : > { %p205_p5 = scmp.eq.s32.totalorder %s43_s22, 0  ;;  %p46_p9 = scmp.eq.s32.totalorder %s45_s19, 0 }
  0x82   : > { %s2079_s21 = sadd.s32 1, %s1483_s26  ;;  %s2080_s15 = sadd.s32 1, %s1495_s29 }
  0x83   : > { %s1793_s24 = scalar_select %p205_p5, %s1483_s26, %s2079_s21  }
  0x84   : > { %s1798_s3 = scalar_select %p46_p9, %s1495_s29, %s2080_s15  }
  0x85   : > { %s1800_s5 = scalar_lea.sflag [#allocation5], %s289_s30  ;;  %p2081_p12 = scmp.ne.s32.totalorder %s2071_s27, 0 }
  0x86   : > { %s1788_s4 = scalar_lea.hbm %s2078_s0, %s1001_s7  ;;  %s1326_s22 = scalar_lea.hbm %s2078_s0, 4096 }
  0x87   : > { %s1321_s6 = scalar_lea.hbm %s1788_s4, 1024  ;;  %p1323_p11 = pneg %p2081_p12 }
  0x88   : > { %p1322_p10 = scmp.ne.s32.totalorder %s1788_s4, %s1321_s6  ;;  %p1327_p2 = scmp.lt.u32.totalorder %s1788_s4, %s2078_s0 }
  0x89   : > { %p1328_p8 = scmp.lt.u32.totalorder %s1326_s22, %s1321_s6  ;;  %p1330_p3 = scmp.lt.u32.totalorder %s1321_s6, %s1788_s4 }
  0x8a   : > { %p1324_p13 = pnand %p1323_p11, %p1322_p10 }
  0x8b   : > { %p1329_p4 = por %p1328_p8, %p1327_p2 }
  0x8c   : > { %p1325_p1 = pneg %p1324_p13 }
  0x8d   : > { %p1331_p6 = por %p1330_p3, %p1329_p4 }
  0x8f   : > { %p1332_p0 = pnand %p1331_p6, %p1325_p1 }
  0x91   : > { %1335 = shalt.err (!%p1332_p0)
}
  0x92   : > { %s1336_s15 = scalar_lea.vmem %s1779_s13, 1024  ;;  %s1522_s30 = smov [#allocation4]  }
  0x93   : > { %p1337_p7 = scmp.ne.s32.totalorder %s1779_s13, %s1336_s15  ;;  %s1341_s21 = sshll.u32 %s1522_s30, 4  ;;  %s1342_s21 = int_to_ptr.vmem [resolvable:$false] %s1341_s21 }
  0x94   : > { %s1343_s14 = scalar_lea.vmem %s1342_s21, 2048  ;;  %p1344_p10 = scmp.lt.s32.totalorder %s1779_s13, %s1342_s21 }
  0x95   : > { %p1339_p5 = pnand %p1337_p7, %p1323_p11  ;;  %p1345_p13 = scmp.lt.s32.totalorder %s1343_s14, %s1336_s15 }
  0x97   : > { %p1340_p9 = pneg %p1339_p5  ;;  %p1346_p2 = por %p1345_p13, %p1344_p10 }
  0x99   : > { %p1347_p8 = pnand %p1346_p2, %p1340_p9 }
  0x9b   : > { %1350 = shalt.err (!%p1347_p8)
}
  0x9c   : > { %s1523_s6 = smov 256   ;;  %s2082_s18 = smov 8  }
  0x9d   : > { %s2083_s22 = smov 128   ;;  %s1836_s15 = scalar_lea.hbm %s2030_s1, %s1001_s7 }
  0x9e   : > { %1123 = dma.hbm_to_vmem [thread:$0]  (!%p2081_p12), %s1788_s4, 1024, %s1779_s13, %s1800_s5, %s1523_s6, %s2083_s22, %s2082_s18  }
  0x9f   : > { %s316_s30 = scalar_lea.vmem [#allocation7], %s1764_s23  ;;  %s312_s14 = sand.u32 1, %s1515_s11  }
  0xa0   : > { %s325_s21 = sshll.u32 %s316_s30, 4  ;;  %s1842_s0 = scalar_lea.sflag [#allocation8], %s312_s14  ;;  %s1840_s21 = int_to_ptr.vmem [resolvable:$true] %s325_s21 }
  0xa1   : > { %s1351_s16 = scalar_lea.hbm %s1836_s15, 1024  ;;  %s1356_s13 = scalar_lea.hbm %s2030_s1, 4096 }
  0xa2   : > { %p1352_p1 = scmp.ne.s32.totalorder %s1836_s15, %s1351_s16  ;;  %p1357_p6 = scmp.lt.u32.totalorder %s1836_s15, %s2030_s1 }
  0xa3   : > { %p1358_p0 = scmp.lt.u32.totalorder %s1356_s13, %s1351_s16  ;;  %p1360_p5 = scmp.lt.u32.totalorder %s1351_s16, %s1836_s15 }
  0xa4   : > { %p1354_p4 = pnand %p1352_p1, %p1323_p11 }
  0xa5   : > { %p1359_p7 = por %p1358_p0, %p1357_p6 }
  0xa6   : > { %p1355_p3 = pneg %p1354_p4 }
  0xa7   : > { %p1361_p9 = por %p1360_p5, %p1359_p7 }
  0xa9   : > { %p1362_p10 = pnand %p1361_p9, %p1355_p3 }
  0xab   : > { %1365 = shalt.err (!%p1362_p10)
}
  0xac   : > { %s1366_s23 = scalar_lea.vmem %s1840_s21, 1024  ;;  %s1524_s2 = smov [#allocation7]  }
  0xad   : > { %p1367_p13 = scmp.ne.s32.totalorder %s1840_s21, %s1366_s23  ;;  %s1371_s19 = sshll.u32 %s1524_s2, 4  ;;  %s1372_s19 = int_to_ptr.vmem [resolvable:$false] %s1371_s19 }
  0xae   : > { %s1373_s30 = scalar_lea.vmem %s1372_s19, 2048  ;;  %p1374_p1 = scmp.lt.s32.totalorder %s1840_s21, %s1372_s19 }
  0xaf   : > { %p1369_p2 = pnand %p1367_p13, %p1323_p11  ;;  %p1375_p4 = scmp.lt.s32.totalorder %s1373_s30, %s1366_s23 }
  0xb1   : > { %p1370_p8 = pneg %p1369_p2  ;;  %p1376_p6 = por %p1375_p4, %p1374_p1 }
  0xb3   : > { %p1377_p0 = pnand %p1376_p6, %p1370_p8 }
  0xb5   : > { %1380 = shalt.err (!%p1377_p0)
}
  0xb6   : > { %1126 = dma.hbm_to_vmem [thread:$0]  (!%p2081_p12), %s1836_s15, 1024, %s1840_s21, %s1842_s0, %s1523_s6, %s2083_s22, %s2082_s18  }
  0xb7   : > { %p2084_p11 = scmp.ne.s32.totalorder %s2069_s20, 0 }
  0xb8   : > { %s339_s16 = sand.u32 (!%p2084_p11), 1, %s1491_s28   ;;  %p2085_p3 = scmp.ne.s32.totalorder (!%p2084_p11), %s2064_s17, 0 }
  0xb9   : > { %337 = sbr.rel (%p2084_p11) target bundleno = 730 (0x2da), region = 48  ;;  %s1007_s14 = sshll.u32 (!%p2084_p11), %s339_s16, 6 }
  0xba   : > { %s340_s5 = scalar_lea.sflag (!%p2084_p11), [#allocation5], %s339_s16  ;;  %s1874_s8 = scalar_lea.vmem (!%p2084_p11), [#allocation4], %s1007_s14 }
  0xc0   : > { %1454 = dma.done.wait (%p2085_p3), %s340_s5, 1024  }
  0xc1   : > { %1456 = vsyncadd (%p2085_p3), %s340_s5, 4294966272  ;;  %s348_s27 = sand.u32 1, %s1624_s12   ;;  %s1881_s0 = scalar_lea.vmem [#allocation7], %s1007_s14 }
  0xc2   : > { %s349_s13 = scalar_lea.sflag [#allocation8], %s348_s27 }
  0xc3   : > { %1458 = dma.done.wait (%p2085_p3), %s349_s13, 1024  }
  0xc4   : > { %1460 = vsyncadd (%p2085_p3), %s349_s13, 4294966272  ;;  %p2086_p12 = scmp.eq.s32.totalorder %s1624_s12, 0 }
  0xc6   : > { %1462 = dma.done.wait (%p2086_p12), [#allocation8], 512   ;;  %p2087_p7 = pmov %p2086_p12 }
  0xc8   : > { %1464 = vsyncadd (%p2087_p7), [#allocation8], 4294966784  ;;  %p2088_p5 = pmov %p2087_p7 }
  0xca   : > { %1466 = dma.done.wait (%p2088_p5), [#allocation11], 1024   ;;  %p2089_p9 = pmov %p2088_p5 }
  0xcb   : > { %s397_s20 = sand.u32 1, %s1479_s25   ;;  %s2090_s18 = sld [smem:[#allocation20_spill]] }
  0xcc   : > { %1468 = vsyncadd (%p2089_p9), [#allocation11], 4294966272  ;;  %s1898_s6 = sshll.u32 %s397_s20, 3 }
  0xcd   : > { %s399_s17 = scalar_lea.vmem [#allocation13], %s1898_s6 }
  0xd1   : > { %p1013_p10 = scmp.ne.s32.totalorder %s2090_s18, 0 }
  0xd2   : > { %vm406_vm0 = vcmask (!%p1013_p10), 261120   ;;  %v1525_v0 = vmov (!%p1013_p10), 0.0  }
  0xd3   : > { %405 = sbr.rel (%p1013_p10) target bundleno = 218 (0xda), region = 72  ;;  %407 = vst.msk [vmem:[#allocation2] sm:$0xff] (!%p1013_p10), %vm406_vm0, %v1525_v0  ;;  %408 = vst.msk [vmem:[#allocation3] sm:$0xff] (!%p1013_p10), %vm406_vm0, %v1525_v0 }
  0xda PF: > { %v410_v1 = vld [vmem:[%s1874_s8] sm:$0xff]  ;;  %v411_v2 = vld [vmem:[%s1874_s8 + $0x8] sm:$0xff]  ;;  %vm418_vm1 = vcmask 261120   ;;  %v412_v3 = vld [vmem:[%s1874_s8 + $0x10] sm:$0xff]  ;;  %vm483_vm2 = vcmask 1041409   ;;  %vm485_vm3 = vcmask 1042434  }
  0xdb   : > { %v413_v4 = vld [vmem:[%s1874_s8 + $0x18] sm:$0xff]  ;;  %v414_v5 = vld [vmem:[%s1874_s8 + $0x20] sm:$0xff]  ;;  %v419_v6 = vsel %vm418_vm1, %v410_v1, 0.0  ;;  %v426_v7 = vsel %vm418_vm1, %v411_v2, 0.0  ;;  %v415_v8 = vld [vmem:[%s1874_s8 + $0x28] sm:$0xff]  ;;  %v433_v13 = vsel %vm418_vm1, %v412_v3, 0.0 }
  0xdc   : > { %v416_v9 = vld [vmem:[%s1874_s8 + $0x30] sm:$0xff]  ;;  %v417_v10 = vld [vmem:[%s1874_s8 + $0x38] sm:$0xff]  ;;  %v420_v11 = vrot.slane %v419_v6, 4  ;;  %v427_v12 = vrot.slane %v426_v7, 4  ;;  %v434_v14 = vrot.slane %v433_v13, 4  ;;  %v440_v15 = vsel %vm418_vm1, %v413_v4, 0.0 }
  0xdd   : > { %v447_v16 = vsel %vm418_vm1, %v414_v5, 0.0  ;;  %v454_v17 = vsel %vm418_vm1, %v415_v8, 0.0  ;;  %v441_v20 = vrot.slane %v440_v15, 4  ;;  %v461_v24 = vsel %vm418_vm1, %v416_v9, 0.0  ;;  %v501_v61 = vld [vmem:[%s1881_s0] sm:$0xff]  ;;  %v502_v2 = vld [vmem:[%s1881_s0 + $0x8] sm:$0xff] }
  0xde   : > { %v421_v18 = vadd.f32 %v420_v11, %v419_v6  ;;  %v428_v19 = vadd.f32 %v427_v12, %v426_v7  ;;  %v448_v21 = vrot.slane %v447_v16, 4  ;;  %v435_v22 = vadd.f32 %v434_v14, %v433_v13  ;;  %v503_v3 = vld [vmem:[%s1881_s0 + $0x10] sm:$0xff]  ;;  %v504_v5 = vld [vmem:[%s1881_s0 + $0x18] sm:$0xff]  ;;  %v505_v9 = vld [vmem:[%s1881_s0 + $0x20] sm:$0xff]  ;;  %s2091_s12 = sld [smem:[#allocation20_spill]] }
  0xdf   : > { %v455_v23 = vrot.slane %v454_v17, 4  ;;  %v468_v25 = vsel %vm418_vm1, %v417_v10, 0.0  ;;  %vm487_vm4 = vcmask 1043459   ;;  %v442_v28 = vadd.f32 %v441_v20, %v440_v15  ;;  %v409_v11 = vld [vmem:[#allocation2] sm:$0xff] }
  0xe0   : > { %v422_v26 = vrot.slane %v421_v18, 2  ;;  %v429_v27 = vrot.slane %v428_v19, 2  ;;  %v449_v29 = vadd.f32 %v448_v21, %v447_v16  ;;  %v436_v30 = vrot.slane %v435_v22, 2 }
  0xe1   : > { %v456_v31 = vadd.f32 %v455_v23, %v454_v17  ;;  %v462_v32 = vrot.slane %v461_v24, 4  ;;  %v469_v33 = vrot.slane %v468_v25, 4  ;;  %v443_v36 = vrot.slane %v442_v28, 2  ;;  %v506_v17 = vld [vmem:[%s1881_s0 + $0x28] sm:$0xff] }
  0xe2   : > { %v423_v34 = vadd.f32 %v422_v26, %v421_v18  ;;  %v430_v35 = vadd.f32 %v429_v27, %v428_v19  ;;  %v450_v37 = vrot.slane %v449_v29, 2  ;;  %v437_v38 = vadd.f32 %v436_v30, %v435_v22  ;;  %v507_v18 = vld [vmem:[%s1881_s0 + $0x30] sm:$0xff]  ;;  %v508_v27 = vld [vmem:[%s1881_s0 + $0x38] sm:$0xff] }
  0xe3   : > { %v457_v39 = vrot.slane %v456_v31, 2  ;;  %v463_v40 = vadd.f32 %v462_v32, %v461_v24  ;;  %v470_v41 = vadd.f32 %v469_v33, %v468_v25  ;;  %v444_v44 = vadd.f32 %v443_v36, %v442_v28 }
  0xe4   : > { %v424_v42 = vrot.slane %v423_v34, 1  ;;  %v431_v43 = vrot.slane %v430_v35, 1  ;;  %v451_v45 = vadd.f32 %v450_v37, %v449_v29  ;;  %v438_v46 = vrot.slane %v437_v38, 1  ;;  %p1014_p13 = scmp.ne.s32.totalorder %s2091_s12, 1 }
  0xe5   : > { %v458_v47 = vadd.f32 %v457_v39, %v456_v31  ;;  %v464_v48 = vrot.slane %v463_v40, 2  ;;  %v471_v49 = vrot.slane %v470_v41, 2  ;;  %v445_v52 = vrot.slane %v444_v44, 1  ;;  %s2092_s21 = sld [smem:[#allocation29_spill]] (!%p1014_p13)  ;;  %s2093_s23 = sld [smem:[#allocation31_spill]] (!%p1014_p13) }
  0xe6   : > { %v425_v50 = vadd.f32 %v424_v42, %v423_v34  ;;  %v432_v51 = vadd.f32 %v431_v43, %v430_v35  ;;  %v452_v53 = vrot.slane %v451_v45, 1  ;;  %v439_v54 = vadd.f32 %v438_v46, %v437_v38 }
  0xe7   : > { %v459_v55 = vrot.slane %v458_v47, 1  ;;  %v465_v56 = vadd.f32 %v464_v48, %v463_v40  ;;  %v472_v57 = vadd.f32 %v471_v49, %v470_v41  ;;  %v446_v58 = vadd.f32 %v445_v52, %v444_v44 }
  0xe8   : > { %v453_v59 = vadd.f32 %v452_v53, %v451_v45  ;;  %v484_v60 = vsel %vm483_vm2, %v432_v51, %v425_v50  ;;  %vm489_vm5 = vcmask 1044484   ;;  %vm491_vm6 = vcmask 1045509  }
  0xe9   : > { %v460_v62 = vadd.f32 %v459_v55, %v458_v47  ;;  %v466_v63 = vrot.slane %v465_v56, 1  ;;  %v473_v0 = vrot.slane %v472_v57, 1  ;;  %v486_v1 = vsel %vm485_vm3, %v439_v54, %v484_v60 }
  0xea   : > { %v488_v4 = vsel %vm487_vm4, %v446_v58, %v486_v1  ;;  %vm493_vm7 = vcmask 1046534   ;;  %vm495_vm8 = vcmask 1047559   ;;  %v509_v10 = vsel %vm418_vm1, %v501_v61, 0.0 }
  0xeb   : > { %v467_v6 = vadd.f32 %v466_v63, %v465_v56  ;;  %v474_v7 = vadd.f32 %v473_v0, %v472_v57  ;;  %v490_v8 = vsel %vm489_vm5, %v453_v59, %v488_v4  ;;  %v510_v13 = vrot.slane %v509_v10, 4 }
  0xec   : > { %v492_v12 = vsel %vm491_vm6, %v460_v62, %v490_v8  ;;  %v516_v14 = vsel %vm418_vm1, %v502_v2, 0.0  ;;  %v523_v15 = vsel %vm418_vm1, %v503_v3, 0.0  ;;  %v530_v21 = vsel %vm418_vm1, %v504_v5, 0.0 }
  0xed   : > { %v494_v16 = vsel %vm493_vm7, %v467_v6, %v492_v12  ;;  %v517_v19 = vrot.slane %v516_v14, 4  ;;  %v524_v20 = vrot.slane %v523_v15, 4  ;;  %v511_v23 = vadd.f32 %v510_v13, %v509_v10 }
  0xee   : > { %v496_v22 = vsel %vm495_vm8, %v474_v7, %v494_v16  ;;  %v531_v24 = vrot.slane %v530_v21, 4  ;;  %v537_v25 = vsel %vm418_vm1, %v505_v9, 0.0  ;;  %v544_v33 = vsel %vm418_vm1, %v506_v17, 0.0 }
  0xef   : > { %v498_v26 = vadd.f32 %v496_v22, %v409_v11  ;;  %v518_v28 = vadd.f32 %v517_v19, %v516_v14  ;;  %v525_v29 = vadd.f32 %v524_v20, %v523_v15  ;;  %v538_v30 = vrot.slane %v537_v25, 4  ;;  %v500_v14 = vld [vmem:[#allocation3] sm:$0xff]  ;;  %v595_v19 = vld [vmem:[#allocation10] sm:$0xff] (!%p1014_p13)  ;;  %v596_v20 = vld [vmem:[#allocation10 + $0x8] sm:$0xff] (!%p1014_p13) }
  0xf0   : > { %v512_v31 = vrot.slane %v511_v23, 2  ;;  %v532_v32 = vadd.f32 %v531_v24, %v530_v21  ;;  %v551_v34 = vsel %vm418_vm1, %v507_v18, 0.0  ;;  %v545_v38 = vrot.slane %v544_v33, 4  ;;  %v591_v21 = vld [vmem:[#allocation9] sm:$0xff] (!%p1014_p13)  ;;  %v592_v24 = vld [vmem:[#allocation9 + $0x8] sm:$0xff] (!%p1014_p13) }
  0xf1   : > { %499 = vst.msk [vmem:[#allocation2] sm:$0xff] %vm418_vm1, %v498_v26  ;;  %v519_v35 = vrot.slane %v518_v28, 2  ;;  %v526_v36 = vrot.slane %v525_v29, 2  ;;  %v539_v37 = vadd.f32 %v538_v30, %v537_v25  ;;  %v552_v41 = vrot.slane %v551_v34, 4  ;;  %v597_v25 = vld [vmem:[#allocation10 + $0x10] sm:$0xff] (!%p1014_p13)  ;;  %v598_v26 = vld [vmem:[#allocation10 + $0x18] sm:$0xff] (!%p1014_p13) }
  0xf2   : > { %v513_v39 = vadd.f32 %v512_v31, %v511_v23  ;;  %v533_v40 = vrot.slane %v532_v32, 2  ;;  %v558_v42 = vsel %vm418_vm1, %v508_v27, 0.0  ;;  %v546_v46 = vadd.f32 %v545_v38, %v544_v33  ;;  %v757_v38 = vld [vmem:[#allocation12 + $0x8] sm:$0xff] (!%p1014_p13) }
  0xf3   : > { %v520_v43 = vadd.f32 %v519_v35, %v518_v28  ;;  %v527_v44 = vadd.f32 %v526_v36, %v525_v29  ;;  %v540_v45 = vrot.slane %v539_v37, 2  ;;  %v553_v49 = vadd.f32 %v552_v41, %v551_v34  ;;  %v593_v28 = vld [vmem:[#allocation9 + $0x10] sm:$0xff] (!%p1014_p13)  ;;  %v594_v29 = vld [vmem:[#allocation9 + $0x18] sm:$0xff] (!%p1014_p13) }
  0xf4   : > { %v514_v47 = vrot.slane %v513_v39, 1  ;;  %v534_v48 = vadd.f32 %v533_v40, %v532_v32  ;;  %v559_v50 = vrot.slane %v558_v42, 4  ;;  %v547_v54 = vrot.slane %v546_v46, 2  ;;  %v758_v40 = vld [vmem:[#allocation12 + $0x10] sm:$0xff] (!%p1014_p13)  ;;  %v759_v41 = vld [vmem:[#allocation12 + $0x18] sm:$0xff] (!%p1014_p13) }
  0xf5   : > { %v521_v51 = vrot.slane %v520_v43, 1  ;;  %v528_v52 = vrot.slane %v527_v44, 1  ;;  %v541_v53 = vadd.f32 %v540_v45, %v539_v37  ;;  %v554_v57 = vrot.slane %v553_v49, 2  ;;  %v756_v37 = vld [vmem:[#allocation12] sm:$0xff] (!%p1014_p13)  ;;  %v1017_v45 = vld [vmem:[%s2092_s21] ss:$0 sm:$0xff] (!%p1014_p13) }
  0xf6   : > { %v515_v55 = vadd.f32 %v514_v47, %v513_v39  ;;  %v535_v56 = vrot.slane %v534_v48, 1  ;;  %v560_v58 = vadd.f32 %v559_v50, %v558_v42  ;;  %v548_v62 = vadd.f32 %v547_v54, %v546_v46 }
  0xf7   : > { %v522_v59 = vadd.f32 %v521_v51, %v520_v43  ;;  %v529_v60 = vadd.f32 %v528_v52, %v527_v44  ;;  %v542_v61 = vrot.slane %v541_v53, 1  ;;  %v555_v0 = vadd.f32 %v554_v57, %v553_v49  ;;  %v1018_v52 = vld [vmem:[%s2093_s23] ss:$0 sm:$0xff] (!%p1014_p13) }
  0xf8   : > { %v536_v63 = vadd.f32 %v535_v56, %v534_v48  ;;  %v561_v1 = vrot.slane %v560_v58, 2  ;;  %v549_v3 = vrot.slane %v548_v62, 1  ;;  %v1526_v22 = vmov (!%p1014_p13), 0.0|0.0   ;;  %v587_v34 = vld [vmem:[#allocation2] sm:$0xff] (!%p1014_p13) }
  0xf9   : > { %v543_v2 = vadd.f32 %v542_v61, %v541_v53  ;;  %v573_v4 = vsel %vm483_vm2, %v522_v59, %v515_v55  ;;  %v556_v5 = vrot.slane %v555_v0, 1  ;;  %1074 = vmatprep.subr.bf16.mxu0 (!%p1014_p13), %v1526_v22  ;;  %1080 = vmatprep.subr.bf16.mxu1 (!%p1014_p13), %v1526_v22  ;;  %v1075_v23 = vpack.c.bf16 (!%p1014_p13), %v596_v20, %v595_v19 }
  0xfa   : > { %v562_v6 = vadd.f32 %v561_v1, %v560_v58  ;;  %v574_v7 = vsel %vm485_vm3, %v529_v60, %v573_v4  ;;  %v550_v8 = vadd.f32 %v549_v3, %v548_v62  ;;  %v1081_v27 = vpack.c.bf16 (!%p1014_p13), %v592_v24, %v591_v21 }
  0xfb   : > { %v575_v9 = vsel %vm487_vm4, %v536_v63, %v574_v7  ;;  %v557_v10 = vadd.f32 %v556_v5, %v555_v0  ;;  %vm1527_vm9 = vmmov (!%p1014_p13), 0   ;;  %v1528_v30 = vmov (!%p1014_p13), 0.0   ;;  %1076 = vmatpush3.bf16.msra.mxu0 (!%p1014_p13), %v1075_v23 }
  0xfc   : > { %v563_v11 = vrot.slane %v562_v6, 1  ;;  %v576_v12 = vsel %vm489_vm5, %v543_v2, %v575_v9  ;;  %1049 = vmatprep.mubr.msk.f32.mxu0 (!%p1014_p13), %vm1527_vm9, %v1528_v30  ;;  %1060 = vmatprep.mubr.msk.f32.mxu1 (!%p1014_p13), %vm1527_vm9, %v1528_v30  ;;  %v1078_v31 = vpack.c.bf16 (!%p1014_p13), %v598_v26, %v597_v25  ;;  %v1084_v33 = vpack.c.bf16 (!%p1014_p13), %v594_v29, %v593_v28 }
  0xfd   : > { %v577_v13 = vsel %vm491_vm6, %v550_v8, %v576_v12  ;;  %586 = sbr.rel (%p1014_p13) target bundleno = 703 (0x2bf), region = 76  ;;  %1082 = vmatpush3.bf16.msra.mxu1 (!%p1014_p13), %v1081_v27  ;;  %1077 = vmatprep.subr.bf16.mxu0 (!%p1014_p13), %v1526_v22  ;;  %v588_v36 = vmul.f32 (!%p1014_p13), 0.0625, %v587_v34  ;;  %v1087_v39 = vpack.c.bf16 (!%p1014_p13), %v757_v38, %v756_v37  ;;  %v1090_v42 = vpack.c.bf16 (!%p1014_p13), %v759_v41, %v758_v40 }
  0xfe   : > { %v564_v15 = vadd.f32 %v563_v11, %v562_v6  ;;  %v578_v16 = vsel %vm493_vm7, %v557_v10, %v577_v13  ;;  %1083 = vmatprep.subr.bf16.mxu1 (!%p1014_p13), %v1526_v22 }
  0xff   : > { %1079 = vmatpush3.bf16.msra.mxu0 (!%p1014_p13), %v1078_v31 }
 0x100   : > { %v579_v17 = vsel %vm495_vm8, %v564_v15, %v578_v16  ;;  %1086 = vmatprep.subr.bf16.mxu0 (!%p1014_p13), %v1526_v22 }
 0x101   : > { %v581_v18 = vadd.f32 %v579_v17, %v500_v14  ;;  %1085 = vmatpush3.bf16.msra.mxu1 (!%p1014_p13), %v1084_v33 }
 0x103   : > { %582 = vst.msk [vmem:[#allocation3] sm:$0xff] %vm418_vm1, %v581_v18 }
 0x104   : > { %1061 = vmatmul.mubr.msk.f32.vlgmr.msra.gmra.mrb[0].mxu1 %vm418_vm1, %v588_v36 }
 0x10a   : > { %v589_v32 = vld [vmem:[#allocation3] sm:$0xff] }
 0x10b   : > { %v590_v35 = vmul.f32 0.0625, %v589_v32 }
 0x10d   : > { %1050 = vmatmul.mubr.msk.f32.vlgmr.msra.gmra.mrb[0].mxu0 %vm418_vm1, %v590_v35 }
 0x10e   : > { %1071 = vmatprep.mubr.msk.f32.mxu0 %vm1527_vm9, %v1528_v30  ;;  %1088 = vmatpush3.bf16.msra.mxu0 %v1087_v39 }
 0x10f   : > { %1089 = vmatprep.subr.bf16.mxu0 %v1526_v22 }
 0x112   : > { %1091 = vmatpush3.bf16.msra.mxu0 %v1090_v42 }
 0x1d7   : > { %v741_v44 = vpop.f32.mrb[0].mxu1 }
 0x1d8   : > { %v1062_v48 = vpop.f32.mrb[1].mxu1 }
 0x1e0   : > { %v668_v43 = vpop.f32.mrb[0].mxu0 }
 0x1e1   : > { %v1051_v46 = vpop.f32.mrb[1].mxu0  ;;  %v742_v47 = vadd.f32 %v741_v44, %v668_v43 }
 0x1e3   : > { %v752_v49 = vadd.f32 %v1017_v45, %v742_v47 }
 0x1e5   : > { %v754_v50 = vmul.f32 0.01, %v752_v49  ;;  %vm753_vm10 = vcmp.gt.f32.partialorder %v752_v49, 0.0 }
 0x1e7   : > { %v755_v51 = vsel %vm753_vm10, %v752_v49, %v754_v50 }
 0x1e8   : > { %1072 = vmatmul.mubr.msk.f32.vlgmr.msra.gmra.mrb[2].mxu0 %vm418_vm1, %v755_v51 }
 0x2bb   : > { %v836_v53 = vpop.f32.mrb[2].mxu0 }
 0x2bc   : > { %v837_v54 = vadd.f32 %v1018_v52, %v836_v53  ;;  %v1073_v55 = vpop.f32.mrb[3].mxu0 }
 0x2be   : > { %840 = vst [vmem:[%s399_s17] sm:$0xff] %v837_v54 }
 0x2bf PF: > { %s2094_s2 = sld [smem:[#allocation21_spill]]  ;;  %s2095_s19 = sld [smem:[#allocation22_spill]] }
 0x2c0   : > { %s2096_s5 = sld [smem:[#allocation32_spill]]  ;;  %s855_s27 = sshll.u32 %s399_s17, 4  ;;  %s856_s27 = int_to_ptr.vmem [resolvable:$true] %s855_s27 }
 0x2c1   : > { %s842_s13 = scalar_lea.sflag [#allocation6], %s397_s20  ;;  %s1381_s0 = scalar_lea.vmem %s856_s27, 128 }
 0x2c2   : > { %p1382_p2 = scmp.ne.s32.totalorder %s856_s27, %s1381_s0  ;;  %s1529_s18 = smov [#allocation13]  }
 0x2c3   : > { %s1385_s12 = sshll.u32 %s1529_s18, 4  ;;  %s1386_s12 = int_to_ptr.vmem [resolvable:$false] %s1385_s12 }
 0x2c4   : > { %s1387_s22 = scalar_lea.vmem %s1386_s12, 256  ;;  %p1388_p6 = scmp.lt.s32.totalorder %s856_s27, %s1386_s12 }
 0x2c5   : > { %s1021_s30 = sshll.u32 %s2094_s2, 7  ;;  %p2097_p8 = scmp.ne.s32.totalorder %s2095_s19, 0 }
 0x2c6   : > { %s1969_s8 = scalar_lea.hbm %s2096_s5, %s1021_s30  ;;  %p1389_p0 = scmp.lt.s32.totalorder %s1387_s22, %s1381_s0 }
 0x2c7   : > { %p1383_p1 = pnand %p1382_p2, %p2097_p8 }
 0x2c8   : > { %p1390_p11 = por %p1389_p0, %p1388_p6 }
 0x2c9   : > { %p1384_p4 = pneg %p1383_p1 }
 0x2cb   : > { %p1391_p3 = pnand %p1390_p11, %p1384_p4 }
 0x2cd   : > { %1394 = shalt.err (!%p1391_p3)
}
 0x2ce   : > { %s1395_s20 = scalar_lea.hbm %s1969_s8, 128  ;;  %s1399_s15 = scalar_lea.hbm %s2096_s5, 256 }
 0x2cf   : > { %p1396_p12 = scmp.ne.s32.totalorder %s1969_s8, %s1395_s20  ;;  %p1400_p9 = scmp.lt.u32.totalorder %s1969_s8, %s2096_s5 }
 0x2d0   : > { %p1401_p10 = scmp.lt.u32.totalorder %s1399_s15, %s1395_s20  ;;  %p1403_p2 = scmp.lt.u32.totalorder %s1395_s20, %s1969_s8 }
 0x2d1   : > { %p1397_p7 = pnand %p1396_p12, %p2097_p8 }
 0x2d2   : > { %p1402_p13 = por %p1401_p10, %p1400_p9 }
 0x2d3   : > { %p1398_p5 = pneg %p1397_p7 }
 0x2d4   : > { %p1404_p1 = por %p1403_p2, %p1402_p13 }
 0x2d6   : > { %p1405_p4 = pnand %p1404_p1, %p1398_p5 }
 0x2d8   : > { %1408 = shalt.err (!%p1405_p4)
}
 0x2d9   : > { %1108 = dma.vmem_to_hbm [thread:$0]  (%p2097_p8), %s856_s27, 128, %s1969_s8, %s842_s13  }
 0x2da PF: > { %s2098_s4 = sld [smem:[#allocation19_spill]]  ;;  %s2099_s23 = sld [smem:[#allocation23_spill]] }
 0x2db   : > { %p1138_p6 = scmp.ge.s32.totalorder %s1515_s11, 2 }
 0x2e0   : > { %s867_s2 = sand.u32 1, %s2098_s4   ;;  %p2100_p0 = scmp.ne.s32.totalorder %s2099_s23, 0 }
 0x2e1   : > { %s868_s30 = scalar_lea.sflag [#allocation6], %s867_s2 }
 0x2e2   : > { %p1128_p11 = pnand %p1138_p6, %p2100_p0 }
 0x2e4   : > { %1470 = dma.done.wait (!%p1128_p11), %s868_s30, 128  }
 0x2e5   : > { %1472 = vsyncadd (!%p1128_p11), %s868_s30, 4294967168  ;;  %s27_s11 = sadd.s32 1, %s1515_s11   ;;  %s2101_s16 = smov %s1793_s24 }
 0x2e6   : > { %p24_p3 = scmp.ge.s32.totalorder %s27_s11, 6   ;;  %s2102_s19 = sld [smem:[#allocation24_spill]] }
 0x2e7   : > { %s2103_s14 = sld [smem:[#allocation25_spill]]  ;;  %s2104_s24 = smov %s1479_s25 }
 0x2e8   : > { %s2105_s25 = smov %s1483_s26  ;;  %s2106_s26 = smov %s2101_s16 }
 0x2e9   : > { %s2107_s27 = smov %s1491_s28  ;;  %s2108_s28 = smov %s1495_s29 }
 0x2ea   : > { %s2109_s29 = smov %s1798_s3  ;;  %s2110_s30 = smov %s1507_s9 }
 0x2eb   : > { %s2111_s8 = smov %s1511_s10  ;;  %26 = sbr.rel (!%p24_p3) target bundleno = 20 (0x14), region = 126 }
 0x2ec   : > { %s2112_s9 = smov %s2102_s19 }
 0x2ed   : > { %s2113_s10 = smov %s2103_s14 }
 0x2f2   :  { %873 = vsyncpa [#allocation5], 1 }
 0x2f3   :  { %875 = vsyncpa [#allocation5 + $0x1], 1 }
 0x2f4   :  { %876 = vsyncpa [#allocation8], 1 }
 0x2f5   :  { %878 = vsyncpa [#allocation8 + $0x1], 1 }
 0x2f6   :  { %879 = vsyncpa [#allocation11], 1 }
 0x2f7   :  { %880 = vsyncpa [#allocation6], 1 }
 0x2f8   :  { %882 = vsyncpa [#allocation6 + $0x1], 1 }

</bundles_post_ra>
